<compile_context>
chip_gen: v7x
topology: tpu7x:2x2x1
jax: 0.10.0
libtpu: 0.0.40
codegen_flags: <defaults>
</compile_context>

<pallas_src>
import functools
import math

import jax
import jax.numpy as jnp
from jax.experimental import pallas as pl
from jax.experimental.pallas import tpu as pltpu


def _round_up(n, m):
    return ((n + m - 1) // m) * m


def dqn_kernel(x_ref, w1_ref, b1_ref, w2_ref, b2_ref, w3_ref, b3_ref, out_ref):
    # x_ref: (TB, n_obs) f32; weights bf16; biases f32; out (TB, n_out_pad) f32.
    x = x_ref[...].astype(jnp.bfloat16)  # cast in-kernel (keeps f32 interface, no wrapper op)
    # layer1 + ReLU (f32 accumulate on the MXU, re-cast to bf16 for the next pass)
    h1 = jnp.dot(x, w1_ref[...], preferred_element_type=jnp.float32) + b1_ref[...]
    h1 = jnp.maximum(h1, 0.0).astype(jnp.bfloat16)
    # layer2 + ReLU
    h2 = jnp.dot(h1, w2_ref[...], preferred_element_type=jnp.float32) + b2_ref[...]
    h2 = jnp.maximum(h2, 0.0).astype(jnp.bfloat16)
    # layer3 (no activation), lane-dense padded width
    out_ref[...] = (
        jnp.dot(h2, w3_ref[...], preferred_element_type=jnp.float32) + b3_ref[...]
    ).astype(out_ref.dtype)


def prepare_params(params):
    """One-time prep (call at init / after each optimizer step, NOT per forward).

    Input params are pre-transposed (in_features, out_features) f32 weights and
    (1, out_features) f32 biases. Returns bf16 weights with the final layer
    zero-padded to a lane-dense (multiple of 128) output width; biases stay f32.
    """
    w1, b1, w2, b2, w3, b3 = params
    H2, n_actions = w3.shape
    n_out_pad = _round_up(max(n_actions, 128), 128)
    w3p = (
        jnp.zeros((H2, n_out_pad), jnp.bfloat16)
        .at[:, :n_actions]
        .set(w3.astype(jnp.bfloat16))
    )
    b3p = (
        jnp.zeros((1, n_out_pad), jnp.float32)
        .at[:, :n_actions]
        .set(b3.astype(jnp.float32))
    )
    return (
        w1.astype(jnp.bfloat16),
        b1.astype(jnp.float32),
        w2.astype(jnp.bfloat16),
        b2.astype(jnp.float32),
        w3p,
        b3p,
    )


def _choose_tiling(B, block_batch):
    """Returns (TB, B_pad, steps). Single step (no padding) for realistic batches."""
    block_batch = _round_up(max(block_batch, 16), 16)  # guard non-multiple-of-16 callers
    if B <= block_batch:
        return B, B, 1  # one grid step, exact batch (no pad op, no double-buffer churn)
    steps = pl.cdiv(B, block_batch)
    if steps % 2 == 1:
        steps += 1  # even split across v7x's 2 TensorCores (megacore)
    TB = _round_up(pl.cdiv(B, steps), 16)  # bf16 sublane packing: multiples of 16 rows
    return TB, TB * steps, steps


@functools.partial(jax.jit, static_argnames=("n_actions", "block_batch"))
def dqn_forward(x, prepped, *, n_actions, block_batch=4096):
    """x: (B, n_observations) f32. prepped: output of prepare_params()."""
    w1, b1, w2, b2, w3p, b3p = prepped
    B, n_obs = x.shape
    H1 = w1.shape[1]
    H2 = w2.shape[1]
    n_out_pad = w3p.shape[1]

    TB, B_pad, steps = _choose_tiling(B, block_batch)
    if B_pad != B:  # only on the very-large-batch multi-step path
        x = jnp.pad(x, ((0, B_pad - B), (0, 0)))
    grid = (steps,)

    flops = 2 * B_pad * (n_obs * H1 + H1 * H2 + H2 * n_out_pad)
    bytes_accessed = (
        B_pad * n_obs * 4                              # x (f32)
        + (w1.size + w2.size + w3p.size) * 2           # weights (bf16)
        + (b1.size + b2.size + b3p.size) * 4           # biases (f32)
        + B_pad * n_out_pad * 4                        # out (f32)
    )
    cost = pl.CostEstimate(flops=flops, transcendentals=0, bytes_accessed=bytes_accessed)

    out_pad = pl.pallas_call(
        dqn_kernel,
        out_shape=jax.ShapeDtypeStruct((B_pad, n_out_pad), jnp.float32),
        grid=grid,
        in_specs=[
            pl.BlockSpec((TB, n_obs), lambda i: (i, 0)),      # x tile (pipelined over batch)
            pl.BlockSpec((n_obs, H1), lambda i: (0, 0)),      # w1 (resident, bf16)
            pl.BlockSpec((1, H1), lambda i: (0, 0)),          # b1 (resident, f32)
            pl.BlockSpec((H1, H2), lambda i: (0, 0)),         # w2 (resident, bf16)
            pl.BlockSpec((1, H2), lambda i: (0, 0)),          # b2 (resident, f32)
            pl.BlockSpec((H2, n_out_pad), lambda i: (0, 0)),  # w3 padded (resident, bf16)
            pl.BlockSpec((1, n_out_pad), lambda i: (0, 0)),   # b3 padded (resident, f32)
        ],
        out_specs=pl.BlockSpec((TB, n_out_pad), lambda i: (i, 0)),
        compiler_params=pltpu.CompilerParams(
            dimension_semantics=("parallel",),
        ),
        cost_estimate=cost,
    )(x, w1, b1, w2, b2, w3p, b3p)

    # TODO(synk): if downstream only needs argmax/max Q (acting) or gathered Q(s,a)
    # (TD target), fuse that reduction into the kernel to drop this slice + writeback.
    return out_pad[:B, :n_actions]


def init_linear(key, fan_in, fan_out):
    # Mirrors PyTorch nn.Linear default init: U(-1/sqrt(fan_in), 1/sqrt(fan_in)).
    kw, kb = jax.random.split(key)
    bound = 1.0 / math.sqrt(fan_in)
    # Stored pre-transposed: (in_features, out_features).
    w = jax.random.uniform(kw, (fan_in, fan_out), jnp.float32, -bound, bound)
    b = jax.random.uniform(kb, (1, fan_out), jnp.float32, -bound, bound)
    return w, b


def reference_forward(x, params):
    w1, b1, w2, b2, w3, b3 = params
    h1 = jnp.maximum(x @ w1 + b1, 0.0)
    h2 = jnp.maximum(h1 @ w2 + b2, 0.0)
    return h2 @ w3 + b3


if __name__ == "__main__":
    n_observations = 4
    n_actions = 2

    key = jax.random.PRNGKey(0)
    k_x, k1, k2, k3 = jax.random.split(key, 4)

    w1, b1 = init_linear(k1, n_observations, 128)
    w2, b2 = init_linear(k2, 128, 128)
    w3, b3 = init_linear(k3, 128, n_actions)
    params = (w1, b1, w2, b2, w3, b3)

    # One-time parameter prep (hoisted out of the per-step forward path).
    prepped = jax.block_until_ready(prepare_params(params))

    ok = True
    # Small (action-selection style) batch and a larger replay-minibatch-style batch.
    for batch in (2, 520):
        kx = jax.random.fold_in(k_x, batch)
        x = jax.random.normal(kx, (batch, n_observations), jnp.float32)

        out = dqn_forward(x, prepped, n_actions=n_actions)
        out = jax.block_until_ready(out)

        ref = reference_forward(x, params)
        assert out.shape == (batch, n_actions)
        # bf16 matmuls with f32 accumulation: loose-but-tight-enough tolerance.
        ok = ok and bool(jnp.allclose(out, ref, atol=5e-2, rtol=5e-2))

    assert ok
    print("KERNEL_OK")
</pallas_src>

<mosaic_0001>
module attributes {stable_mosaic.version = 11 : i64} {
  func.func @dqn_kernel(%arg0: i32, %arg1: memref<2x4xf32, #tpu.memory_space<vmem>>, %arg2: memref<4x128xbf16, #tpu.memory_space<vmem>>, %arg3: memref<1x128xf32, #tpu.memory_space<vmem>>, %arg4: memref<128x128xbf16, #tpu.memory_space<vmem>>, %arg5: memref<1x128xf32, #tpu.memory_space<vmem>>, %arg6: memref<128x128xbf16, #tpu.memory_space<vmem>>, %arg7: memref<1x128xf32, #tpu.memory_space<vmem>>, %arg8: memref<2x128xf32, #tpu.memory_space<vmem>>) attributes {dimension_semantics = [#tpu.dimension_semantics<parallel>], iteration_bounds = array<i64: 1>, scalar_prefetch = 0 : i64, scratch_operands = 0 : i64, tpu.core_type = #tpu.core_type<tc>, window_params = [{transform_indices = @transform_0, window_bounds = array<i64: 2, 4>}, {pipeline_mode = #tpu.pipeline_mode<synchronous>, transform_indices = @transform_1, window_bounds = array<i64: 4, 128>}, {pipeline_mode = #tpu.pipeline_mode<synchronous>, transform_indices = @transform_2, window_bounds = array<i64: 1, 128>}, {pipeline_mode = #tpu.pipeline_mode<synchronous>, transform_indices = @transform_3, window_bounds = array<i64: 128, 128>}, {pipeline_mode = #tpu.pipeline_mode<synchronous>, transform_indices = @transform_4, window_bounds = array<i64: 1, 128>}, {pipeline_mode = #tpu.pipeline_mode<synchronous>, transform_indices = @transform_5, window_bounds = array<i64: 128, 128>}, {pipeline_mode = #tpu.pipeline_mode<synchronous>, transform_indices = @transform_6, window_bounds = array<i64: 1, 128>}, {transform_indices = @transform_7, window_bounds = array<i64: 2, 128>}]} {
    %c0 = arith.constant 0 : index
    %c0_0 = arith.constant 0 : index
    %0 = vector.load %arg1[%c0, %c0_0] : memref<2x4xf32, #tpu.memory_space<vmem>>, vector<2x4xf32>
    %1 = arith.truncf %0 : vector<2x4xf32> to vector<2x4xbf16>
    %c0_1 = arith.constant 0 : index
    %c0_2 = arith.constant 0 : index
    %2 = vector.load %arg2[%c0_1, %c0_2] : memref<4x128xbf16, #tpu.memory_space<vmem>>, vector<4x128xbf16>
    %cst = arith.constant dense<0.000000e+00> : vector<2x128xf32>
    %3 = tpu.matmul %1, %2, %cst {dimension_numbers = #tpu.dot_dimension_numbers<[1], [0], [0], [1], [0, 0, 1, 1], [], []>} : vector<2x4xbf16>, vector<4x128xbf16>, vector<2x128xf32> -> vector<2x128xf32>
    %c0_3 = arith.constant 0 : index
    %c0_4 = arith.constant 0 : index
    %4 = vector.load %arg3[%c0_3, %c0_4] : memref<1x128xf32, #tpu.memory_space<vmem>>, vector<1x128xf32>
    %5 = vector.broadcast %4 : vector<1x128xf32> to vector<2x128xf32>
    %6 = arith.addf %3, %5 : vector<2x128xf32>
    %cst_5 = arith.constant 0.000000e+00 : f32
    %7 = vector.broadcast %cst_5 : f32 to vector<2x128xf32>
    %8 = arith.maximumf %6, %7 : vector<2x128xf32>
    %9 = arith.truncf %8 : vector<2x128xf32> to vector<2x128xbf16>
    %c0_6 = arith.constant 0 : index
    %c0_7 = arith.constant 0 : index
    %10 = vector.load %arg4[%c0_6, %c0_7] : memref<128x128xbf16, #tpu.memory_space<vmem>>, vector<128x128xbf16>
    %cst_8 = arith.constant dense<0.000000e+00> : vector<2x128xf32>
    %11 = tpu.matmul %9, %10, %cst_8 {dimension_numbers = #tpu.dot_dimension_numbers<[1], [0], [0], [1], [0, 0, 1, 1], [], []>} : vector<2x128xbf16>, vector<128x128xbf16>, vector<2x128xf32> -> vector<2x128xf32>
    %c0_9 = arith.constant 0 : index
    %c0_10 = arith.constant 0 : index
    %12 = vector.load %arg5[%c0_9, %c0_10] : memref<1x128xf32, #tpu.memory_space<vmem>>, vector<1x128xf32>
    %13 = vector.broadcast %12 : vector<1x128xf32> to vector<2x128xf32>
    %14 = arith.addf %11, %13 : vector<2x128xf32>
    %cst_11 = arith.constant 0.000000e+00 : f32
    %15 = vector.broadcast %cst_11 : f32 to vector<2x128xf32>
    %16 = arith.maximumf %14, %15 : vector<2x128xf32>
    %17 = arith.truncf %16 : vector<2x128xf32> to vector<2x128xbf16>
    %c0_12 = arith.constant 0 : index
    %c0_13 = arith.constant 0 : index
    %18 = vector.load %arg6[%c0_12, %c0_13] : memref<128x128xbf16, #tpu.memory_space<vmem>>, vector<128x128xbf16>
    %cst_14 = arith.constant dense<0.000000e+00> : vector<2x128xf32>
    %19 = tpu.matmul %17, %18, %cst_14 {dimension_numbers = #tpu.dot_dimension_numbers<[1], [0], [0], [1], [0, 0, 1, 1], [], []>} : vector<2x128xbf16>, vector<128x128xbf16>, vector<2x128xf32> -> vector<2x128xf32>
    %c0_15 = arith.constant 0 : index
    %c0_16 = arith.constant 0 : index
    %20 = vector.load %arg7[%c0_15, %c0_16] : memref<1x128xf32, #tpu.memory_space<vmem>>, vector<1x128xf32>
    %21 = vector.broadcast %20 : vector<1x128xf32> to vector<2x128xf32>
    %22 = arith.addf %19, %21 : vector<2x128xf32>
    %c0_17 = arith.constant 0 : index
    %c0_18 = arith.constant 0 : index
    %23 = vector.load %arg8[%c0_17, %c0_18] : memref<2x128xf32, #tpu.memory_space<vmem>>, vector<2x128xf32>
    tpu.vector_store %arg8[%c0_17, %c0_18], %22 {strides = array<i32>} : memref<2x128xf32, #tpu.memory_space<vmem>>, vector<2x128xf32>,
    return
  }
  func.func @transform_0(%arg0: i32) -> (i32, i32) {
    %c0_i32 = arith.constant 0 : i32
    %c0_i32_0 = arith.constant 0 : i32
    return %arg0, %c0_i32 : i32, i32
  }
  func.func @transform_1(%arg0: i32) -> (i32, i32) {
    %c0_i32 = arith.constant 0 : i32
    %c0_i32_0 = arith.constant 0 : i32
    %c0_i32_1 = arith.constant 0 : i32
    return %c0_i32, %c0_i32_0 : i32, i32
  }
  func.func @transform_2(%arg0: i32) -> (i32, i32) {
    %c0_i32 = arith.constant 0 : i32
    %c0_i32_0 = arith.constant 0 : i32
    %c0_i32_1 = arith.constant 0 : i32
    return %c0_i32, %c0_i32_0 : i32, i32
  }
  func.func @transform_3(%arg0: i32) -> (i32, i32) {
    %c0_i32 = arith.constant 0 : i32
    %c0_i32_0 = arith.constant 0 : i32
    %c0_i32_1 = arith.constant 0 : i32
    return %c0_i32, %c0_i32_0 : i32, i32
  }
  func.func @transform_4(%arg0: i32) -> (i32, i32) {
    %c0_i32 = arith.constant 0 : i32
    %c0_i32_0 = arith.constant 0 : i32
    %c0_i32_1 = arith.constant 0 : i32
    return %c0_i32, %c0_i32_0 : i32, i32
  }
  func.func @transform_5(%arg0: i32) -> (i32, i32) {
    %c0_i32 = arith.constant 0 : i32
    %c0_i32_0 = arith.constant 0 : i32
    %c0_i32_1 = arith.constant 0 : i32
    return %c0_i32, %c0_i32_0 : i32, i32
  }
  func.func @transform_6(%arg0: i32) -> (i32, i32) {
    %c0_i32 = arith.constant 0 : i32
    %c0_i32_0 = arith.constant 0 : i32
    %c0_i32_1 = arith.constant 0 : i32
    return %c0_i32, %c0_i32_0 : i32, i32
  }
  func.func @transform_7(%arg0: i32) -> (i32, i32) {
    %c0_i32 = arith.constant 0 : i32
    %c0_i32_0 = arith.constant 0 : i32
    return %arg0, %c0_i32 : i32, i32
  }
}

</mosaic_0001>

<bundles_post_ra>
// kernel: dqn_forward.1
= control target key start
LH: loop header
LB: loop body
LE: loop exit
PB: predicated region body
PF: predicated region fallthrough
CT: control target
= control target key end

     0   :  { %12 = vsyncpa [#allocation3], 0  ;;  %s709_s0 = inlined_call_operand.hbm [shape: f32[2,4], index: 0, kind: input, shape index: {}]   ;;  %s710_s1 = inlined_call_operand.vmem [shape: bf16[4,128], index: 1, kind: input, shape index: {}]   ;;  %s711_s2 = inlined_call_operand.vmem [shape: f32[1,128], index: 2, kind: input, shape index: {}]   ;;  %s712_s3 = inlined_call_operand.hbm [shape: bf16[128,128], index: 3, kind: input, shape index: {}]   ;;  %s713_s4 = inlined_call_operand.vmem [shape: f32[1,128], index: 4, kind: input, shape index: {}]   ;;  %s714_s5 = inlined_call_operand.hbm [shape: bf16[128,128], index: 5, kind: input, shape index: {}]   ;;  %s715_s6 = inlined_call_operand.vmem [shape: f32[1,128], index: 6, kind: input, shape index: {}]   ;;  %s716_s7 = inlined_call_operand.hbm [shape: f32[2,128], index: 7, kind: output, shape index: {}]  }
   0x1   :  { %13 = vsyncpa [#allocation6], 0 }
   0x2   :  { %14 = vsyncpa [#allocation4], 0  ;;  %s572_s24 = smov [#allocation5]   ;;  %s478_s28 = scalar_lea.hbm %s712_s3, 1024 }
   0x3   :  { %s34_s25 = sshll.u32 %s572_s24, 4  ;;  %p479_p0 = scmp.ne.s32.totalorder %s712_s3, %s478_s28  ;;  %s35_s25 = int_to_ptr.vmem [resolvable:$true] %s34_s25 }
   0x4   :  { %p482_p1 = scmp.lt.u32.totalorder %s478_s28, %s712_s3 }
   0x6   :  { %p484_p2 = pnand %p482_p1, %p479_p0 }
   0x8   :  { %487 = shalt.err (!%p484_p2)
}
   0x9   :  { %s488_s10 = scalar_lea.vmem %s35_s25, 1024  ;;  %p493_p4 = scmp.lt.s32.totalorder %s35_s25, %s35_s25 }
   0xa   :  { %p489_p3 = scmp.ne.s32.totalorder %s35_s25, %s488_s10  ;;  %p494_p5 = scmp.lt.s32.totalorder %s488_s10, %s488_s10 }
   0xc   :  { %p495_p6 = por %p494_p5, %p493_p4 }
   0xe   :  { %p496_p7 = pnand %p495_p6, %p489_p3 }
  0x10   :  { %499 = shalt.err (!%p496_p7)
}
  0x11   :  { %s573_s11 = smov 64   ;;  %s574_s12 = smov 4  }
  0x12   :  { %40 = dma.hbm_to_vmem [thread:$0]  %s712_s3, 1024, %s35_s25, [#allocation6], %s573_s11, %s573_s11, %s574_s12  }
  0x13   :  { %s575_s15 = smov [#allocation2]   ;;  %s576_s17 = smov [#allocation7]  }
  0x14   :  { %s21_s16 = sshll.u32 %s575_s15, 4  ;;  %s48_s18 = sshll.u32 %s576_s17, 4  ;;  %s22_s16 = int_to_ptr.vmem [resolvable:$true] %s21_s16  ;;  %s49_s18 = int_to_ptr.vmem [resolvable:$true] %s48_s18 }
  0x15   :  { %s500_s21 = scalar_lea.hbm %s709_s0, 32 }
  0x16   :  { %p501_p8 = scmp.ne.s32.totalorder %s709_s0, %s500_s21  ;;  %p504_p9 = scmp.lt.u32.totalorder %s500_s21, %s709_s0 }
  0x18   :  { %p506_p10 = pnand %p504_p9, %p501_p8 }
  0x1a   :  { %509 = shalt.err (!%p506_p10)
}
  0x1b   :  { %s510_s3 = scalar_lea.vmem %s22_s16, 32  ;;  %p515_p12 = scmp.lt.s32.totalorder %s22_s16, %s22_s16 }
  0x1c   :  { %p511_p11 = scmp.ne.s32.totalorder %s22_s16, %s510_s3  ;;  %p516_p13 = scmp.lt.s32.totalorder %s510_s3, %s510_s3 }
  0x1e   :  { %p517_p0 = por %p516_p13, %p515_p12 }
  0x20   :  { %p518_p1 = pnand %p517_p0, %p511_p11 }
  0x22   :  { %521 = shalt.err (!%p518_p1)
}
  0x23   :  { %24 = dma.hbm_to_vmem [thread:$0]  %s709_s0, 32, %s22_s16, [#allocation3]  }
  0x24   :  { %s522_s30 = scalar_lea.hbm %s714_s5, 1024 }
  0x25   :  { %p523_p2 = scmp.ne.s32.totalorder %s714_s5, %s522_s30  ;;  %p526_p3 = scmp.lt.u32.totalorder %s522_s30, %s714_s5 }
  0x27   :  { %p528_p4 = pnand %p526_p3, %p523_p2 }
  0x29   :  { %531 = shalt.err (!%p528_p4)
}
  0x2a   :  { %s532_s14 = scalar_lea.vmem %s49_s18, 1024  ;;  %p537_p6 = scmp.lt.s32.totalorder %s49_s18, %s49_s18 }
  0x2b   :  { %p533_p5 = scmp.ne.s32.totalorder %s49_s18, %s532_s14  ;;  %p538_p7 = scmp.lt.s32.totalorder %s532_s14, %s532_s14 }
  0x2d   :  { %p539_p8 = por %p538_p7, %p537_p6 }
  0x2f   :  { %p540_p9 = pnand %p539_p8, %p533_p5 }
  0x31   :  { %543 = shalt.err (!%p540_p9)
}
  0x32   :  { %54 = dma.hbm_to_vmem [thread:$0]  %s714_s5, 1024, %s49_s18, [#allocation6], %s573_s11, %s573_s11, %s574_s12  }
  0x33   :  { %566 = dma.done.wait [#allocation3], 32  }
  0x34   :  { %567 = vsyncadd [#allocation3], 4294967264 }
  0x35   :  { %568 = dma.done.wait [#allocation6], 2048  }
  0x36   :  { %569 = vsyncadd [#allocation6], 4294965248  ;;  %v577_v0 = vmov 0.0   ;;  %vm578_vm0 = vmmov 0   ;;  %vm81_vm1 = vcmask 1041408   ;;  %v462_v5 = vld [vmem:[#allocation5] sm:$0xff]  }
  0x37   :  { %408 = vmatprep.subr.bf16.mxu0 %v577_v0  ;;  %410 = vmatprep.mubr.msk.bf16.mxu0 %vm578_vm0, %v577_v0  ;;  %v69_v1 = vld [vmem:[%s710_s1] sm:$0x3]  ;;  %vm77_vm2 = vcmask 31744   ;;  %v463_v6 = vld [vmem:[#allocation5 + $0x8] sm:$0xff]   ;;  %v464_v7 = vld [vmem:[#allocation5 + $0x10] sm:$0xff]   ;;  %s579_s19 = smov [#allocation8]  }
  0x38   :  { %414 = vmatprep.subr.bf16.mxu1 %v577_v0  ;;  %430 = vmatprep.mubr.msk.bf16.mxu1 %vm578_vm0, %v577_v0  ;;  %v67_v2 = vld [vmem:[#allocation2] sm:$0x3]  ;;  %v83_v3 = vsel %vm81_vm1, %v69_v1, 0  ;;  %v466_v9 = vld [vmem:[#allocation5 + $0x20] sm:$0xff]   ;;  %v467_v10 = vld [vmem:[#allocation5 + $0x28] sm:$0xff]   ;;  %s358_s20 = sshll.u32 %s579_s19, 4  ;;  %s359_s20 = int_to_ptr.vmem [resolvable:$true] %s358_s20 }
  0x39   :  { %v68_v4 = vpack.c.bf16 %v67_v2, %v67_v2  ;;  %409 = vmatpush3.bf16.msra.mxu0 %v83_v3  ;;  %415 = vmatpush3.bf16.msra.mxu1 %v462_v5  ;;  %v465_v8 = vld [vmem:[#allocation5 + $0x18] sm:$0xff]   ;;  %v468_v11 = vld [vmem:[#allocation5 + $0x30] sm:$0xff]   ;;  %v470_v13 = vld [vmem:[#allocation7] sm:$0xff]   ;;  %p549_p11 = scmp.lt.s32.totalorder %s359_s20, %s359_s20 }
  0x3a   :  { %434 = vmatprep.subr.bf16.mxu0 %v577_v0  ;;  %416 = vmatprep.subr.bf16.mxu1 %v577_v0  ;;  %v469_v12 = vld [vmem:[#allocation5 + $0x38] sm:$0xff]   ;;  %v471_v14 = vld [vmem:[#allocation7 + $0x8] sm:$0xff]   ;;  %v472_v15 = vld [vmem:[#allocation7 + $0x10] sm:$0xff]  }
  0x3b   :  { %v473_v16 = vld [vmem:[#allocation7 + $0x18] sm:$0xff]   ;;  %v474_v17 = vld [vmem:[#allocation7 + $0x20] sm:$0xff]   ;;  %v475_v18 = vld [vmem:[#allocation7 + $0x28] sm:$0xff]  }
  0x3c   :  { %411 = vmatmul.mubr.msk.bf16.vlgmr.msra.gmra.mrb[0].mxu0 %vm77_vm2, %v68_v4  ;;  %v368_v19 = vld [vmem:[%s711_s2] ss:$0 sm:$0xff]  ;;  %v476_v27 = vld [vmem:[#allocation7 + $0x30] sm:$0xff]  }
  0x3d   :  { %450 = vmatprep.mubr.msk.bf16.mxu0 %vm578_vm0, %v577_v0  ;;  %417 = vmatpush3.bf16.msra.mxu1 %v463_v6  ;;  %v477_v28 = vld [vmem:[#allocation7 + $0x38] sm:$0xff]  }
  0x3e   :  { %418 = vmatprep.subr.bf16.mxu1 %v577_v0  ;;  %435 = vmatpush3.bf16.msra.mxu0 %v470_v13  ;;  %v370_v29 = vld [vmem:[%s713_s4] ss:$0 sm:$0xff]  ;;  %s544_s4 = scalar_lea.vmem %s359_s20, 32 }
  0x3f   :  { %436 = vmatprep.subr.bf16.mxu0 %v577_v0  ;;  %v379_v37 = vld [vmem:[%s715_s6] ss:$0 sm:$0xff]  ;;  %p545_p10 = scmp.ne.s32.totalorder %s359_s20, %s544_s4  ;;  %p550_p12 = scmp.lt.s32.totalorder %s544_s4, %s544_s4 }
  0x41   :  { %419 = vmatpush3.bf16.msra.mxu1 %v464_v7  ;;  %p551_p13 = por %p550_p12, %p549_p11 }
  0x42   :  { %420 = vmatprep.subr.bf16.mxu1 %v577_v0  ;;  %437 = vmatpush3.bf16.msra.mxu0 %v471_v14 }
  0x43   :  { %438 = vmatprep.subr.bf16.mxu0 %v577_v0  ;;  %p552_p0 = pnand %p551_p13, %p545_p10 }
  0x45   :  { %421 = vmatpush3.bf16.msra.mxu1 %v465_v8 }
  0x46   :  { %422 = vmatprep.subr.bf16.mxu1 %v577_v0  ;;  %439 = vmatpush3.bf16.msra.mxu0 %v472_v15 }
  0x47   :  { %440 = vmatprep.subr.bf16.mxu0 %v577_v0 }
  0x49   :  { %423 = vmatpush3.bf16.msra.mxu1 %v466_v9 }
  0x4a   :  { %424 = vmatprep.subr.bf16.mxu1 %v577_v0  ;;  %441 = vmatpush3.bf16.msra.mxu0 %v473_v16 }
  0x4b   :  { %442 = vmatprep.subr.bf16.mxu0 %v577_v0 }
  0x4d   :  { %425 = vmatpush3.bf16.msra.mxu1 %v467_v10 }
  0x4e   :  { %426 = vmatprep.subr.bf16.mxu1 %v577_v0  ;;  %443 = vmatpush3.bf16.msra.mxu0 %v474_v17 }
  0x4f   :  { %444 = vmatprep.subr.bf16.mxu0 %v577_v0 }
  0x51   :  { %427 = vmatpush3.bf16.msra.mxu1 %v468_v11 }
  0x52   :  { %428 = vmatprep.subr.bf16.mxu1 %v577_v0  ;;  %445 = vmatpush3.bf16.msra.mxu0 %v475_v18 }
  0x53   :  { %446 = vmatprep.subr.bf16.mxu0 %v577_v0 }
  0x55   :  { %429 = vmatpush3.bf16.msra.mxu1 %v469_v12 }
  0x56   :  { %447 = vmatpush3.bf16.msra.mxu0 %v476_v27 }
  0x57   :  { %448 = vmatprep.subr.bf16.mxu0 %v577_v0 }
  0x5a   :  { %449 = vmatpush3.bf16.msra.mxu0 %v477_v28 }
 0x10f   :  { %v119_v20 = vpop.f32.mrb[0].mxu0 }
 0x110   :  { %v120_v21 = vadd.f32 %v368_v19, %v119_v20  ;;  %v412_v22 = vpop.f32.mrb[1].mxu0 }
 0x111   :  { %v122_v23 = vpop.f32.mrb[2].mxu0 }
 0x112   :  { %v125_v24 = vmax.f32 %v120_v21, 0.0  ;;  %v413_v25 = vpop.f32.mrb[3].mxu0 }
 0x114   :  { %v126_v26 = vpack.c.bf16 %v125_v24, %v125_v24 }
 0x116   :  { %431 = vmatmul.mubr.bf16.vlgmr.msra.gmra.mrb[0].mxu1 %v126_v26 }
 0x1e9   :  { %v232_v30 = vpop.f32.mrb[0].mxu1 }
 0x1ea   :  { %v233_v31 = vadd.f32 %v370_v29, %v232_v30  ;;  %v432_v32 = vpop.f32.mrb[1].mxu1 }
 0x1eb   :  { %v235_v33 = vpop.f32.mrb[2].mxu1 }
 0x1ec   :  { %v238_v34 = vmax.f32 %v233_v31, 0.0  ;;  %v433_v35 = vpop.f32.mrb[3].mxu1 }
 0x1ee   :  { %v239_v36 = vpack.c.bf16 %v238_v34, %v238_v34 }
 0x1f0   :  { %451 = vmatmul.mubr.bf16.vlgmr.msra.gmra.mrb[4].mxu0 %v239_v36 }
 0x2c3   :  { %v345_v38 = vpop.f32.mrb[4].mxu0 }
 0x2c4   :  { %v346_v39 = vadd.f32 %v379_v37, %v345_v38  ;;  %v452_v40 = vpop.f32.mrb[5].mxu0 }
 0x2c5   :  { %v348_v41 = vpop.f32.mrb[6].mxu0 }
 0x2c6   :  { %351 = vst [vmem:[#allocation8] sm:$0x3] %v346_v39  ;;  %v453_v42 = vpop.f32.mrb[7].mxu0 }
 0x2c7   :  { %555 = shalt.err (!%p552_p0)
}
 0x2c8   :  { %s556_s6 = scalar_lea.hbm %s716_s7, 32 }
 0x2c9   :  { %p557_p1 = scmp.ne.s32.totalorder %s716_s7, %s556_s6  ;;  %p560_p2 = scmp.lt.u32.totalorder %s556_s6, %s716_s7 }
 0x2cb   :  { %p562_p3 = pnand %p560_p2, %p557_p1 }
 0x2cd   :  { %565 = shalt.err (!%p562_p3)
}
 0x2ce   :  { %361 = dma.vmem_to_hbm [thread:$0]  %s359_s20, 32, %s716_s7, [#allocation4]  }
 0x2cf   :  { %570 = dma.done.wait [#allocation4], 32  }
 0x2d0   :  { %571 = vsyncadd [#allocation4], 4294967264 }
 0x2d1   :  { %365 = vsyncpa [#allocation3], 1 }
 0x2d2   :  { %366 = vsyncpa [#allocation6], 1 }
 0x2d3   :  { %367 = vsyncpa [#allocation4], 1 }

</bundles_post_ra>
